<compile_context>
chip_gen: v5e
topology: v5e:2x2
jax: 0.10.0
libtpu: 0.0.40
codegen_flags: <defaults>
</compile_context>

<pallas_src>
import functools
import math

import jax
import jax.numpy as jnp
import numpy as np
from jax.experimental import pallas as pl
from jax.experimental.pallas import tpu as pltpu


def _slim_conv1d_kernel(x_ref, w_ref, b_ref, o_ref, xp_ref, rhs_ref, *,
                        C_in, K, L, L_pad, L_out, stride, pad_l, Nb):
    """One batch block (Nb elements) per grid step.

    x_ref   : (1, C_in, Nb, L)        raw (unpadded) input block
    w_ref   : (C_out, K*C_in)         weight, rows ordered k*C_in + ci
    b_ref   : (C_out, 1)
    o_ref   : (1, C_out, Nb*L_out)    lane-dense output slab (col = n*L_out+lo)
    xp_ref  : (C_in, Nb, L_pad)       VMEM scratch: zero-padded input
    rhs_ref : (K*C_in, Nb*L_out)      VMEM scratch: im2col matrix
    """
    # ---- zero-pad the length axis inside VMEM (no extra HBM pass) ----------
    if pad_l or (L_pad != pad_l + L):
        xp_ref[...] = jnp.zeros_like(xp_ref)
    xp_ref[:, :, pad_l:pad_l + L] = x_ref[0]          # (C_in, Nb, L)
    xpv = xp_ref[...]                                  # (C_in, Nb, L_pad)

    # ---- im2col: rhs[k*C_in + ci, n*L_out + lo] = xpad[n, ci, lo*s + k] ----
    span = (L_out - 1) * stride + 1
    for k in range(K):                 # K, Nb are small static ints (unrolled)
        for n in range(Nb):
            sl = xpv[:, n, k:k + span:stride]          # (C_in, L_out)
            rhs_ref[k * C_in:(k + 1) * C_in,
                    n * L_out:(n + 1) * L_out] = sl

    # ---- single MXU matmul, contraction depth C_in*K -----------------------
    acc = jnp.dot(w_ref[...], rhs_ref[...],
                  preferred_element_type=jnp.float32)  # (C_out, Nb*L_out)
    acc = jnp.maximum(acc + b_ref[...], 0.0)           # bias + ReLU ('default')
    o_ref[0] = acc.astype(o_ref.dtype)


def _pick_batch_block(N, C_in, C_out, K, L, L_pad, L_out, itemsize,
                      vmem_budget_bytes=8 << 20, nb_cap=16):
    """Batch elements per grid step.

    As many as a conservative VMEM budget allows (double-buffered in/out
    blocks + scratch), capped so the static im2col unroll (K*Nb stores) stays
    small.  Among feasible choices, prefer an Nb whose output lane width
    Nb*L_out is a multiple of 128 (unmasked vector stores), as long as that
    doesn't increase the padded batch size.
    """
    per_n = itemsize * (2 * C_in * L + 2 * C_out * L_out
                        + C_in * L_pad + C_in * K * L_out)
    nb_max = max(1, min(N, nb_cap, vmem_budget_bytes // max(per_n, 1)))

    candidates = {int(nb_max)}
    lane_q = 128 // math.gcd(128, max(L_out, 1))   # smallest Nb giving 128-wide lanes
    if lane_q <= nb_max:
        candidates.add(int((nb_max // lane_q) * lane_q))

    def padded_total(nb):
        return -(-N // nb) * nb

    # minimize padded work; prefer lane-aligned; then larger blocks
    nb = min(candidates,
             key=lambda nb: (padded_total(nb), (nb * L_out) % 128 != 0, -nb))
    return int(nb)


def slim_conv1d(x, weight, bias, *, stride, padding):
    """Forward pass of SlimConv1d: pad -> conv1d -> ReLU."""
    if x.ndim == 4:                               # torch.squeeze(x, dim=2)
        x = jnp.squeeze(x, axis=2)
    N, C_in, L = x.shape
    C_out, _, K = weight.shape

    if not padding:
        pad_l = pad_r = 0
    elif isinstance(padding, int):
        pad_l = pad_r = padding                   # nn.ConstantPad1d(int, 0)
    else:
        pad_l, pad_r = padding
    L_pad = L + pad_l + pad_r
    L_out = (L_pad - K) // stride + 1

    # ---- batch blocking -----------------------------------------------------
    Nb = _pick_batch_block(N, C_in, C_out, K, L, L_pad, L_out,
                           jnp.dtype(x.dtype).itemsize)
    G = -(-N // Nb)
    Np = G * Nb
    if Np != N:                                   # rare fallback for ragged N
        x = jnp.pad(x, ((0, Np - N), (0, 0), (0, 0)))

    # ---- wrapper-side layout plumbing (cheap XLA reshapes/transposes) -------
    # input pre-blocked so every BlockSpec's last two dims equal full dims
    x_blk = x.reshape(G, Nb, C_in, L).transpose(0, 2, 1, 3)   # (G, C_in, Nb, L)
    w2 = weight.transpose(0, 2, 1).reshape(C_out, K * C_in)   # rows k*C_in+ci
    b2 = bias.reshape(C_out, 1)

    kernel = functools.partial(
        _slim_conv1d_kernel, C_in=C_in, K=K, L=L, L_pad=L_pad, L_out=L_out,
        stride=stride, pad_l=pad_l, Nb=Nb)

    out_flat = pl.pallas_call(
        kernel,
        out_shape=jax.ShapeDtypeStruct((G, C_out, Nb * L_out), x.dtype),
        grid=(G,),
        in_specs=[
            pl.BlockSpec((1, C_in, Nb, L), lambda g: (g, 0, 0, 0)),
            pl.BlockSpec((C_out, K * C_in), lambda g: (0, 0)),
            pl.BlockSpec((C_out, 1), lambda g: (0, 0)),
        ],
        out_specs=pl.BlockSpec((1, C_out, Nb * L_out), lambda g: (g, 0, 0)),
        scratch_shapes=[
            pltpu.VMEM((C_in, Nb, L_pad), x.dtype),          # padded input
            pltpu.VMEM((K * C_in, Nb * L_out), x.dtype),     # im2col matrix
        ],
        compiler_params=pltpu.CompilerParams(
            dimension_semantics=("parallel",),
            vmem_limit_bytes=32 * 1024 * 1024,
        ),
    )(x_blk, w2, b2)

    # (G, C_out, Nb*L_out) -> (N, C_out, L_out)
    out = out_flat.reshape(G, C_out, Nb, L_out).transpose(0, 2, 1, 3)
    return out.reshape(Np, C_out, L_out)[:N]


def _reference(x, weight, bias, *, stride, padding):
    """Pure-JAX reference (lax conv) to validate the kernel."""
    if x.ndim == 4:
        x = jnp.squeeze(x, axis=2)
    pad_l, pad_r = padding
    out = jax.lax.conv_general_dilated(
        x, weight,
        window_strides=(stride,),
        padding=((pad_l, pad_r),),
        dimension_numbers=("NCH", "OIH", "NCH"),
    )
    out = out + bias[None, :, None]
    return jnp.maximum(out, 0.0)


if __name__ == "__main__":
    # SlimConv1d(in_channels=4, out_channels=8, kernel=3, stride=1,
    #            padding=(1, 1), activation_fn='default' -> ReLU, bias_init=0)
    N, C_in, L = 2, 4, 16
    C_out, K, stride = 8, 3, 1
    padding = (1, 1)

    key = jax.random.PRNGKey(0)
    kx, kw = jax.random.split(key)

    # Input with a singleton height dim (exercises the squeeze(dim=2) path).
    x = jax.random.normal(kx, (N, C_in, 1, L), dtype=jnp.float32)

    # Deterministic xavier_uniform_-style Conv1d weight (C_out, C_in, K):
    fan_in, fan_out = C_in * K, C_out * K
    bound = float(np.sqrt(6.0 / (fan_in + fan_out)))
    weight = jax.random.uniform(kw, (C_out, C_in, K), dtype=jnp.float32,
                                minval=-bound, maxval=bound)
    bias = jnp.zeros((C_out,), dtype=jnp.float32)   # bias_init = 0

    out = slim_conv1d(x, weight, bias, stride=stride, padding=padding)
    out = jax.block_until_ready(out)

    ref = _reference(x, weight, bias, stride=stride, padding=padding)
    np.testing.assert_allclose(np.asarray(out), np.asarray(ref),
                               rtol=1e-5, atol=1e-5)
    print("KERNEL_OK")
</pallas_src>

<mosaic_0001>
module attributes {stable_mosaic.version = 11 : i64} {
  func.func @_slim_conv1d_kernel(%arg0: i32, %arg1: memref<1x4x2x16xf32, #tpu.memory_space<vmem>>, %arg2: memref<8x12xf32, #tpu.memory_space<vmem>>, %arg3: memref<8x1xf32, #tpu.memory_space<vmem>>, %arg4: memref<1x8x32xf32, #tpu.memory_space<vmem>>, %arg5: memref<4x2x18xf32, #tpu.memory_space<vmem>>, %arg6: memref<12x32xf32, #tpu.memory_space<vmem>>) attributes {dimension_semantics = [#tpu.dimension_semantics<parallel>], iteration_bounds = array<i64: 1>, scalar_prefetch = 0 : i64, scratch_operands = 2 : i64, tpu.core_type = #tpu.core_type<tc>, window_params = [{transform_indices = @transform_0, window_bounds = array<i64: 1, 4, 2, 16>}, {pipeline_mode = #tpu.pipeline_mode<synchronous>, transform_indices = @transform_1, window_bounds = array<i64: 8, 12>}, {pipeline_mode = #tpu.pipeline_mode<synchronous>, transform_indices = @transform_2, window_bounds = array<i64: 8, 1>}, {transform_indices = @transform_3, window_bounds = array<i64: 1, 8, 32>}]} {
    %cst = arith.constant 0.000000e+00 : f32
    %0 = vector.broadcast %cst : f32 to vector<4x2x18xf32>
    %c0 = arith.constant 0 : index
    %c0_0 = arith.constant 0 : index
    %c0_1 = arith.constant 0 : index
    %1 = vector.load %arg5[%c0, %c0_0, %c0_1] : memref<4x2x18xf32, #tpu.memory_space<vmem>>, vector<4x2x18xf32>
    tpu.vector_store %arg5[%c0, %c0_0, %c0_1], %0 {strides = array<i32>} : memref<4x2x18xf32, #tpu.memory_space<vmem>>, vector<4x2x18xf32>,
    %c0_2 = arith.constant 0 : index
    %c0_3 = arith.constant 0 : index
    %c0_4 = arith.constant 0 : index
    %c0_5 = arith.constant 0 : index
    %2 = vector.load %arg1[%c0_2, %c0_3, %c0_4, %c0_5] : memref<1x4x2x16xf32, #tpu.memory_space<vmem>>, vector<1x4x2x16xf32>
    %3 = vector.shape_cast %2 : vector<1x4x2x16xf32> to vector<4x2x16xf32>
    %c0_6 = arith.constant 0 : index
    %c0_7 = arith.constant 0 : index
    %c1 = arith.constant 1 : index
    %4 = vector.load %arg5[%c0_6, %c0_7, %c1] : memref<4x2x18xf32, #tpu.memory_space<vmem>>, vector<4x2x16xf32>
    tpu.vector_store %arg5[%c0_6, %c0_7, %c1], %3 {strides = array<i32>} : memref<4x2x18xf32, #tpu.memory_space<vmem>>, vector<4x2x16xf32>,
    %c0_8 = arith.constant 0 : index
    %c0_9 = arith.constant 0 : index
    %c0_10 = arith.constant 0 : index
    %5 = vector.load %arg5[%c0_8, %c0_9, %c0_10] : memref<4x2x18xf32, #tpu.memory_space<vmem>>, vector<4x2x18xf32>
    %6 = vector.extract_strided_slice %5 {offsets = [0, 0, 0], sizes = [4, 1, 16], strides = [1, 1, 1]} : vector<4x2x18xf32> to vector<4x1x16xf32>
    %7 = vector.shape_cast %6 : vector<4x1x16xf32> to vector<4x16xf32>
    %c0_11 = arith.constant 0 : index
    %c0_12 = arith.constant 0 : index
    %8 = vector.load %arg6[%c0_11, %c0_12] : memref<12x32xf32, #tpu.memory_space<vmem>>, vector<4x16xf32>
    tpu.vector_store %arg6[%c0_11, %c0_12], %7 {strides = array<i32>} : memref<12x32xf32, #tpu.memory_space<vmem>>, vector<4x16xf32>,
    %9 = vector.extract_strided_slice %5 {offsets = [0, 1, 0], sizes = [4, 1, 16], strides = [1, 1, 1]} : vector<4x2x18xf32> to vector<4x1x16xf32>
    %10 = vector.shape_cast %9 : vector<4x1x16xf32> to vector<4x16xf32>
    %c0_13 = arith.constant 0 : index
    %c16 = arith.constant 16 : index
    %11 = vector.load %arg6[%c0_13, %c16] : memref<12x32xf32, #tpu.memory_space<vmem>>, vector<4x16xf32>
    tpu.vector_store %arg6[%c0_13, %c16], %10 {strides = array<i32>} : memref<12x32xf32, #tpu.memory_space<vmem>>, vector<4x16xf32>,
    %12 = vector.extract_strided_slice %5 {offsets = [0, 0, 1], sizes = [4, 1, 16], strides = [1, 1, 1]} : vector<4x2x18xf32> to vector<4x1x16xf32>
    %13 = vector.shape_cast %12 : vector<4x1x16xf32> to vector<4x16xf32>
    %c4 = arith.constant 4 : index
    %c0_14 = arith.constant 0 : index
    %14 = vector.load %arg6[%c4, %c0_14] : memref<12x32xf32, #tpu.memory_space<vmem>>, vector<4x16xf32>
    tpu.vector_store %arg6[%c4, %c0_14], %13 {strides = array<i32>} : memref<12x32xf32, #tpu.memory_space<vmem>>, vector<4x16xf32>,
    %15 = vector.extract_strided_slice %5 {offsets = [0, 1, 1], sizes = [4, 1, 16], strides = [1, 1, 1]} : vector<4x2x18xf32> to vector<4x1x16xf32>
    %16 = vector.shape_cast %15 : vector<4x1x16xf32> to vector<4x16xf32>
    %c4_15 = arith.constant 4 : index
    %c16_16 = arith.constant 16 : index
    %17 = vector.load %arg6[%c4_15, %c16_16] : memref<12x32xf32, #tpu.memory_space<vmem>>, vector<4x16xf32>
    tpu.vector_store %arg6[%c4_15, %c16_16], %16 {strides = array<i32>} : memref<12x32xf32, #tpu.memory_space<vmem>>, vector<4x16xf32>,
    %18 = vector.extract_strided_slice %5 {offsets = [0, 0, 2], sizes = [4, 1, 16], strides = [1, 1, 1]} : vector<4x2x18xf32> to vector<4x1x16xf32>
    %19 = vector.shape_cast %18 : vector<4x1x16xf32> to vector<4x16xf32>
    %c8 = arith.constant 8 : index
    %c0_17 = arith.constant 0 : index
    %20 = vector.load %arg6[%c8, %c0_17] : memref<12x32xf32, #tpu.memory_space<vmem>>, vector<4x16xf32>
    tpu.vector_store %arg6[%c8, %c0_17], %19 {strides = array<i32>} : memref<12x32xf32, #tpu.memory_space<vmem>>, vector<4x16xf32>,
    %21 = vector.extract_strided_slice %5 {offsets = [0, 1, 2], sizes = [4, 1, 16], strides = [1, 1, 1]} : vector<4x2x18xf32> to vector<4x1x16xf32>
    %22 = vector.shape_cast %21 : vector<4x1x16xf32> to vector<4x16xf32>
    %c8_18 = arith.constant 8 : index
    %c16_19 = arith.constant 16 : index
    %23 = vector.load %arg6[%c8_18, %c16_19] : memref<12x32xf32, #tpu.memory_space<vmem>>, vector<4x16xf32>
    tpu.vector_store %arg6[%c8_18, %c16_19], %22 {strides = array<i32>} : memref<12x32xf32, #tpu.memory_space<vmem>>, vector<4x16xf32>,
    %c0_20 = arith.constant 0 : index
    %c0_21 = arith.constant 0 : index
    %24 = vector.load %arg2[%c0_20, %c0_21] : memref<8x12xf32, #tpu.memory_space<vmem>>, vector<8x12xf32>
    %c0_22 = arith.constant 0 : index
    %c0_23 = arith.constant 0 : index
    %25 = vector.load %arg6[%c0_22, %c0_23] : memref<12x32xf32, #tpu.memory_space<vmem>>, vector<12x32xf32>
    %cst_24 = arith.constant dense<0.000000e+00> : vector<8x32xf32>
    %26 = tpu.matmul %24, %25, %cst_24 {dimension_numbers = #tpu.dot_dimension_numbers<[1], [0], [0], [1], [0, 0, 1, 1], [], []>} : vector<8x12xf32>, vector<12x32xf32>, vector<8x32xf32> -> vector<8x32xf32>
    %c0_25 = arith.constant 0 : index
    %c0_26 = arith.constant 0 : index
    %27 = vector.load %arg3[%c0_25, %c0_26] : memref<8x1xf32, #tpu.memory_space<vmem>>, vector<8x1xf32>
    %28 = vector.broadcast %27 : vector<8x1xf32> to vector<8x32xf32>
    %29 = arith.addf %26, %28 : vector<8x32xf32>
    %cst_27 = arith.constant 0.000000e+00 : f32
    %30 = vector.broadcast %cst_27 : f32 to vector<8x32xf32>
    %31 = arith.maximumf %29, %30 : vector<8x32xf32>
    %c0_28 = arith.constant 0 : index
    %c0_29 = arith.constant 0 : index
    %c0_30 = arith.constant 0 : index
    %32 = vector.load %arg4[%c0_28, %c0_29, %c0_30] : memref<1x8x32xf32, #tpu.memory_space<vmem>>, vector<1x8x32xf32>
    %33 = vector.shape_cast %32 : vector<1x8x32xf32> to vector<8x32xf32>
    %34 = vector.shape_cast %31 : vector<8x32xf32> to vector<1x8x32xf32>
    tpu.vector_store %arg4[%c0_28, %c0_29, %c0_30], %34 {strides = array<i32>} : memref<1x8x32xf32, #tpu.memory_space<vmem>>, vector<1x8x32xf32>,
    return
  }
  func.func @transform_0(%arg0: i32) -> (i32, i32, i32, i32) {
    %c0_i32 = arith.constant 0 : i32
    %c0_i32_0 = arith.constant 0 : i32
    %c0_i32_1 = arith.constant 0 : i32
    %c0_i32_2 = arith.constant 0 : i32
    return %arg0, %c0_i32, %c0_i32_0, %c0_i32_1 : i32, i32, i32, i32
  }
  func.func @transform_1(%arg0: i32) -> (i32, i32) {
    %c0_i32 = arith.constant 0 : i32
    %c0_i32_0 = arith.constant 0 : i32
    %c0_i32_1 = arith.constant 0 : i32
    return %c0_i32, %c0_i32_0 : i32, i32
  }
  func.func @transform_2(%arg0: i32) -> (i32, i32) {
    %c0_i32 = arith.constant 0 : i32
    %c0_i32_0 = arith.constant 0 : i32
    %c0_i32_1 = arith.constant 0 : i32
    return %c0_i32, %c0_i32_0 : i32, i32
  }
  func.func @transform_3(%arg0: i32) -> (i32, i32, i32) {
    %c0_i32 = arith.constant 0 : i32
    %c0_i32_0 = arith.constant 0 : i32
    %c0_i32_1 = arith.constant 0 : i32
    return %arg0, %c0_i32, %c0_i32_0 : i32, i32, i32
  }
}

</mosaic_0001>

<bundles_post_ra>
// kernel: tpu_custom_call.1
= control target key start
LH: loop header
LB: loop body
LE: loop exit
PB: predicated region body
PF: predicated region fallthrough
CT: control target
= control target key end

     0   :  { %8 = vsyncpa [#allocation5], 0  ;;  %s280_s0 = inlined_call_operand.vmem [shape: f32[1,4,2,16], index: 0, kind: input, shape index: {}]   ;;  %s281_s1 = inlined_call_operand.hbm [shape: f32[8,12], index: 1, kind: input, shape index: {}]   ;;  %s282_s2 = inlined_call_operand.vmem [shape: f32[8,1], index: 2, kind: input, shape index: {}]   ;;  %s283_s3 = inlined_call_operand.hbm [shape: f32[1,8,32], index: 3, kind: output, shape index: {}]  }
   0x1   :  { %9 = vsyncpa [#allocation6], 0  ;;  %s17_s14 = sshll.u32 %s281_s1, 4  ;;  %s226_s15 = smov [#allocation4]   ;;  %s18_s14 = int_to_ptr.hbm [resolvable:$true] %s17_s14 }
   0x2   :  { %s19_s16 = sshll.u32 %s226_s15, 4  ;;  %s20_s16 = int_to_ptr.vmem [resolvable:$true] %s19_s16 }
   0x3   :  { %22 = dma.hbm_to_vmem [thread:$0]  %s18_s14, 128, %s20_s16, [#allocation5]  }
   0x4   :  { %222 = dma.done.wait [#allocation5], 128  }
   0x5   :  { %223 = vsyncadd [#allocation5], 4294967168  ;;  %vm29_vm0 = vcmask 140288   ;;  %v227_v0 = vmov 0.0   ;;  %v35_v1 = vld [vmem:[%s280_s0 + $0x2] sm:$0x3] }
   0x6   :  { %31 = vst.msk [vmem:[#allocation2 + $0x2] sm:$0x3] %vm29_vm0, %v227_v0  ;;  %v34_v2 = vld [vmem:[%s280_s0] sm:$0x3]  ;;  %s228_s1 = smov 1   ;;  %vm54_vm1 = vcmask 132104  }
   0x7   :  { %30 = vst.msk [vmem:[#allocation2] sm:$0x3] %vm29_vm0, %v227_v0  ;;  %44 = vrot.lane.b32.xlu0 %v35_v1, %s228_s1  ;;  %42 = vrot.lane.b32.xlu1 %v34_v2, %s228_s1  ;;  %v36_v3 = vld [vmem:[%s280_s0 + $0x4] sm:$0x3]  ;;  %v37_v4 = vld [vmem:[%s280_s0 + $0x6] sm:$0x3] }
   0x8   :  { %32 = vst.msk [vmem:[#allocation2 + $0x4] sm:$0x3] %vm29_vm0, %v227_v0  ;;  %vm71_vm2 = vcmask 1042434   ;;  %vm68_vm3 = vcmask 1041409   ;;  %vm74_vm4 = vcmask 1043459   ;;  %vm81_vm5 = vcmask 1044484  }
   0x9   :  { %33 = vst.msk [vmem:[#allocation2 + $0x6] sm:$0x3] %vm29_vm0, %v227_v0  ;;  %vm77_vm6 = vcmask 125952   ;;  %s229_s0 = smov 16   ;;  %s230_s25 = smov 127   ;;  %v107_v23 = vld [vmem:[%s282_s2] sm:$0xff] }
   0xa   :  { %s231_s26 = smov 126   ;;  %s232_s27 = smov 14   ;;  %v234_v24 = vmov 0   ;;  %vm86_vm7 = vcmask 258177   ;;  %vm117_vm8 = vcmask 1043456   ;;  %v104_v30 = vld [vmem:[#allocation4] sm:$0xff] }
   0xb   :  { %s233_s28 = smov 15   ;;  %173 = vset.pattern.permute.xlu0 %v234_v24  ;;  %vm113_vm9 = vcmask 97280   ;;  %s235_s2 = smov [#allocation7]   ;;  %vm142_vm10 = vcmask 261120  }
   0xc   :  { %s149_s4 = sshll.u32 %s235_s2, 4  ;;  %s151_s7 = sshll.u32 %s283_s3, 4  ;;  %s150_s4 = int_to_ptr.vmem [resolvable:$true] %s149_s4  ;;  %s152_s7 = int_to_ptr.hbm [resolvable:$true] %s151_s7 }
   0xf   :  { %46 = vrot.lane.b32.xlu0 %v36_v3, %s228_s1  ;;  %48 = vrot.lane.b32.xlu1 %v37_v4, %s228_s1 }
  0x79   :  { %v45_v5 = vpop.permute.xlu0 %44  ;;  %v43_v6 = vpop.permute.xlu1 %42 }
  0x7a   :  { %56 = vst.msk [vmem:[#allocation2 + $0x2] sm:$0x3] %vm54_vm1, %v45_v5 }
  0x7b   :  { %55 = vst.msk [vmem:[#allocation2] sm:$0x3] %vm54_vm1, %v43_v6 }
  0x81   :  { %v47_v7 = vpop.permute.xlu0 %46  ;;  %v49_v8 = vpop.permute.xlu1 %48  ;;  %v60_v9 = vld [vmem:[#allocation2 + $0x2] sm:$0x3] }
  0x82   :  { %57 = vst.msk [vmem:[#allocation2 + $0x4] sm:$0x3] %vm54_vm1, %v47_v7  ;;  %v67_v10 = vrot.slane %v60_v9, 7  ;;  %v59_v11 = vld [vmem:[#allocation2] sm:$0x3] }
  0x83   :  { %58 = vst.msk [vmem:[#allocation2 + $0x6] sm:$0x3] %vm54_vm1, %v49_v8 }
  0x84   :  { %v79_v16 = vsel %vm71_vm2, %v67_v10, %v59_v11  ;;  %v69_v17 = vsel %vm68_vm3, %v67_v10, %v59_v11 }
  0x89   :  { %v61_v12 = vld [vmem:[#allocation2 + $0x4] sm:$0x3] }
  0x8a   :  { %v62_v13 = vld [vmem:[#allocation2 + $0x6] sm:$0x3]  ;;  %v70_v14 = vrot.slane %v61_v12, 6 }
  0x8b   :  { %v73_v15 = vrot.slane %v62_v13, 5 }
  0x8c   :  { %v80_v18 = vsel %vm74_vm4, %v70_v14, %v79_v16  ;;  %v72_v19 = vsel %vm71_vm2, %v70_v14, %v69_v17 }
  0x8d   :  { %v82_v20 = vsel %vm81_vm5, %v73_v15, %v80_v18  ;;  %v75_v21 = vsel %vm74_vm4, %v73_v15, %v72_v19 }
  0x8e   :  { %83 = vrot.lane.b32.xlu1 %v82_v20, %s229_s0  ;;  %88 = vrot.lane.b32.xlu0 %v75_v21, %s230_s25  ;;  %78 = vst.msk [vmem:[#allocation3] sm:$0xf] %vm77_vm6, %v75_v21 }
  0x8f   :  { %96 = vrot.lane.b32.xlu2 %v75_v21, %s231_s26 }
  0x96   :  { %110 = vperm.xlu0 %173, %v107_v23  }
  0x97   :  { %100 = vrot.lane.b32.xlu2 %v82_v20, %s232_s27 }
  0x9f   :  { %92 = vrot.lane.b32.xlu2 %v82_v20, %s233_s28 }
  0xe9   :  { %v97_v22 = vpop.permute.xlu2 %96 }
  0xea   :  { %99 = vst.msk [vmem:[#allocation3 + $0x8] sm:$0xf] %vm77_vm6, %v97_v22 }
  0xf1   :  { %v101_v25 = vpop.permute.xlu2 %100 }
  0xf2   :  { %103 = vst.msk [vmem:[#allocation3 + $0x7] sm:$0x1e] %vm86_vm7, %v101_v25 }
  0xf9   :  { %v106_v26 = vld [vmem:[#allocation3 + $0x8] sm:$0xf]  ;;  %v93_v29 = vpop.permute.xlu2 %92 }
  0xfa   :  { %161 = vmatpush.msk.msra.mxu0 %vm117_vm8, %v106_v26 }
 0x100   :  { %v84_v27 = vpop.permute.xlu1 %83  ;;  %v89_v28 = vpop.permute.xlu0 %88 }
 0x101   :  { %87 = vst.msk [vmem:[#allocation3 - $0x1] sm:$0x1e] %vm86_vm7, %v84_v27 }
 0x102   :  { %91 = vst.msk [vmem:[#allocation3 + $0x4] sm:$0xf] %vm77_vm6, %v89_v28 }
 0x103   :  { %95 = vst.msk [vmem:[#allocation3 + $0x3] sm:$0x1e] %vm86_vm7, %v93_v29 }
 0x108   :  { %v111_v32 = vpop.permute.xlu0 %110 }
 0x10a   :  { %v105_v31 = vld [vmem:[#allocation3] sm:$0xff] }
 0x10b   :  { %136 = vmatpush.msra.mxu0 %v105_v31 }
 0x10c   :  { %162 = vmatmul.msk.f32.vlgmr.msra.gmra.mxu0 %vm113_vm9, %v104_v30 }
 0x189   :  { %v138_v33 = vpop.f32.mrf.mxu0 }
 0x18a   :  { %v139_v34 = vadd.f32 %v138_v33, %v111_v32 }
 0x18c   :  { %v141_v35 = vmax.f32 %v139_v34, 0.0 }
 0x18e   :  { %143 = vst.msk [vmem:[#allocation7] sm:$0xff] %vm142_vm10, %v141_v35 }
 0x18f   :  { %154 = dma.vmem_to_hbm [thread:$0]  %s150_s4, 128, %s152_s7, [#allocation6]  }
 0x190   :  { %224 = dma.done.wait [#allocation6], 128  }
 0x191   :  { %225 = vsyncadd [#allocation6], 4294967168 }
 0x192   :  { %159 = vsyncpa [#allocation5], 1 }
 0x193   :  { %160 = vsyncpa [#allocation6], 1 }

</bundles_post_ra>
